<compile_context>
chip_gen: v6e
topology: v6e:2x2x1
jax: 0.10.0
libtpu: 0.0.40
codegen_flags: <defaults>
</compile_context>

<pallas_src>
import functools

import jax
import jax.numpy as jnp
from jax import lax
from jax.experimental import pallas as pl
from jax.experimental.pallas import tpu as pltpu


def _round_up(n, m):
    return ((n + m - 1) // m) * m


_CHUNK = 256  # inner compute chunk (MXU M dim); bounds the h1/h2 live range


def _pick_tile_b(B):
    """Batch-tile heuristic.

    Big tiles (256-512 rows) amortize the ~0.35 us per-grid-step overhead and
    fill the MXU rows; keep >= 2 grid steps when the batch allows so the
    'parallel' axis can shard across v7x's two TensorCores.
    """
    B8 = _round_up(B, 8)
    if B8 <= 512:
        # small batch: split roughly in half (still >= 2 grid steps)
        return max(8, _round_up(pl.cdiv(B8, 2), 8))
    if B8 < 1024:
        return 256
    return 512


def _encoder_kernel(x_ref, w1_ref, b1_ref, w2_ref, b2_ref, o_ref, *, chunk):
    # Weights / biases are grid-invariant: load once, hoisted out of the loop.
    w1 = w1_ref[...]            # (D_in, H)  bf16
    w2 = w2_ref[...]            # (H, F)     bf16
    b1 = b1_ref[...]            # (1, H)     f32
    b2 = b2_ref[...]            # (1, F)     f32

    n_chunks = x_ref.shape[0] // chunk

    def do_rows(r0):
        xc = x_ref[pl.ds(r0, chunk), :]                                   # bf16 (chunk, D_in)
        h1 = jnp.dot(xc, w1, preferred_element_type=jnp.float32)          # MXU, f32 acc
        h1 = jnp.maximum(h1 + b1, 0.0)                                    # bias + ReLU (VPU)
        # cast only the matmul *input* to bf16; accumulation stays f32
        h2 = jnp.dot(h1.astype(jnp.bfloat16), w2,
                     preferred_element_type=jnp.float32)                  # MXU, f32 acc
        h2 = jnp.maximum(h2 + b2, 0.0)
        o_ref[pl.ds(r0, chunk), :] = h2.astype(o_ref.dtype)

    if n_chunks == 1:
        do_rows(0)
    else:
        def body(c, carry):
            do_rows(pl.multiple_of(c * chunk, chunk))
            return carry
        lax.fori_loop(0, n_chunks, body, 0, unroll=True)


def snpd_census_forward(x, w1, b1, w2, b2, *, tile_b=None,
                        out_dtype=jnp.float32):
    """Encoder forward: relu(relu(x @ w1 + b1) @ w2 + b2), fused in one kernel."""
    B, D_in = x.shape
    H = w1.shape[1]
    F = w2.shape[1]

    if tile_b is None:
        tile_b = _pick_tile_b(B)
    tile_b = max(8, _round_up(int(tile_b), 8))
    chunk = min(tile_b, _CHUNK)
    assert tile_b % chunk == 0

    # bf16 matmul inputs; biases stay f32.
    x16 = x.astype(jnp.bfloat16)
    w1_16 = w1.astype(jnp.bfloat16)
    w2_16 = w2.astype(jnp.bfloat16)
    b1f = b1.astype(jnp.float32).reshape(1, H)
    b2f = b2.astype(jnp.float32).reshape(1, F)

    # Pad the batch to a multiple of tile_b (real census batch sizes aren't);
    # padded rows are zeros and get sliced off after the call.
    B_pad = _round_up(B, tile_b)
    if B_pad != B:
        x16 = jnp.pad(x16, ((0, B_pad - B), (0, 0)))

    grid = (B_pad // tile_b,)
    kernel = functools.partial(_encoder_kernel, chunk=chunk)

    out = pl.pallas_call(
        kernel,
        out_shape=jax.ShapeDtypeStruct((B_pad, F), out_dtype),
        grid_spec=pltpu.PrefetchScalarGridSpec(
            num_scalar_prefetch=0,
            grid=grid,
            in_specs=[
                pl.BlockSpec((tile_b, D_in), lambda i: (i, 0)),  # x: batch-tiled
                pl.BlockSpec((D_in, H),      lambda i: (0, 0)),  # W1: resident
                pl.BlockSpec((1, H),         lambda i: (0, 0)),  # b1: resident
                pl.BlockSpec((H, F),         lambda i: (0, 0)),  # W2: resident
                pl.BlockSpec((1, F),         lambda i: (0, 0)),  # b2: resident
            ],
            out_specs=pl.BlockSpec((tile_b, F), lambda i: (i, 0)),
        ),
        compiler_params=pltpu.CompilerParams(
            dimension_semantics=("parallel",)),
    )(x16, w1_16, b1f, w2_16, b2f)

    if B_pad != B:
        out = out[:B]
    return out


def _reference(x, w1, b1, w2, b2):
    # Mirrors the kernel's numerics: bf16 matmul inputs, f32 accumulation.
    h1 = jnp.dot(x.astype(jnp.bfloat16), w1.astype(jnp.bfloat16),
                 preferred_element_type=jnp.float32) + b1.reshape(1, -1)
    h1 = jnp.maximum(h1, 0.0)
    h2 = jnp.dot(h1.astype(jnp.bfloat16), w2.astype(jnp.bfloat16),
                 preferred_element_type=jnp.float32) + b2.reshape(1, -1)
    return jnp.maximum(h2, 0.0)


if __name__ == "__main__":
    # Small, deterministic shapes consistent with a tabular census encoder.
    # B=19 deliberately exercises the pad-to-tile path.
    D_IN, H, NUM_FEATURES = 32, 128, 128

    key = jax.random.PRNGKey(0)
    kx, k1, k2, k3, k4 = jax.random.split(key, 5)

    w1 = jax.random.normal(k1, (D_IN, H), dtype=jnp.float32) * (1.0 / jnp.sqrt(D_IN))
    b1 = jax.random.normal(k2, (1, H), dtype=jnp.float32) * 0.01
    w2 = jax.random.normal(k3, (H, NUM_FEATURES), dtype=jnp.float32) * (1.0 / jnp.sqrt(H))
    b2 = jax.random.normal(k4, (1, NUM_FEATURES), dtype=jnp.float32) * 0.01

    ok = True
    for B in (19, 16):
        xk = jax.random.fold_in(kx, B)
        x = jax.random.normal(xk, (B, D_IN), dtype=jnp.float32)

        out = snpd_census_forward(x, w1, b1, w2, b2)
        out = jax.block_until_ready(out)

        ref = _reference(x, w1, b1, w2, b2)
        ok = ok and (out.shape == (B, NUM_FEATURES))
        ok = ok and bool(jnp.allclose(out, ref, atol=2e-2, rtol=2e-2))

    assert ok, "mismatch vs reference"
    print("KERNEL_OK")
</pallas_src>

<mosaic_0001>
module attributes {stable_mosaic.version = 11 : i64} {
  func.func @_encoder_kernel(%arg0: i32, %arg1: memref<16x32xbf16, #tpu.memory_space<vmem>>, %arg2: memref<32x128xbf16, #tpu.memory_space<vmem>>, %arg3: memref<1x128xf32, #tpu.memory_space<vmem>>, %arg4: memref<128x128xbf16, #tpu.memory_space<vmem>>, %arg5: memref<1x128xf32, #tpu.memory_space<vmem>>, %arg6: memref<16x128xf32, #tpu.memory_space<vmem>>) attributes {dimension_semantics = [#tpu.dimension_semantics<parallel>], iteration_bounds = array<i64: 2>, scalar_prefetch = 0 : i64, scratch_operands = 0 : i64, tpu.core_type = #tpu.core_type<tc>, window_params = [{transform_indices = @transform_0, window_bounds = array<i64: 16, 32>}, {pipeline_mode = #tpu.pipeline_mode<synchronous>, transform_indices = @transform_1, window_bounds = array<i64: 32, 128>}, {pipeline_mode = #tpu.pipeline_mode<synchronous>, transform_indices = @transform_2, window_bounds = array<i64: 1, 128>}, {pipeline_mode = #tpu.pipeline_mode<synchronous>, transform_indices = @transform_3, window_bounds = array<i64: 128, 128>}, {pipeline_mode = #tpu.pipeline_mode<synchronous>, transform_indices = @transform_4, window_bounds = array<i64: 1, 128>}, {transform_indices = @transform_5, window_bounds = array<i64: 16, 128>}]} {
    %c0 = arith.constant 0 : index
    %c0_0 = arith.constant 0 : index
    %0 = vector.load %arg2[%c0, %c0_0] : memref<32x128xbf16, #tpu.memory_space<vmem>>, vector<32x128xbf16>
    %c0_1 = arith.constant 0 : index
    %c0_2 = arith.constant 0 : index
    %1 = vector.load %arg4[%c0_1, %c0_2] : memref<128x128xbf16, #tpu.memory_space<vmem>>, vector<128x128xbf16>
    %c0_3 = arith.constant 0 : index
    %c0_4 = arith.constant 0 : index
    %2 = vector.load %arg3[%c0_3, %c0_4] : memref<1x128xf32, #tpu.memory_space<vmem>>, vector<1x128xf32>
    %c0_5 = arith.constant 0 : index
    %c0_6 = arith.constant 0 : index
    %3 = vector.load %arg5[%c0_5, %c0_6] : memref<1x128xf32, #tpu.memory_space<vmem>>, vector<1x128xf32>
    %c0_7 = arith.constant 0 : index
    %c0_8 = arith.constant 0 : index
    %4 = vector.load %arg1[%c0_7, %c0_8] : memref<16x32xbf16, #tpu.memory_space<vmem>>, vector<16x32xbf16>
    %cst = arith.constant dense<0.000000e+00> : vector<16x128xf32>
    %5 = tpu.matmul %4, %0, %cst {dimension_numbers = #tpu.dot_dimension_numbers<[1], [0], [0], [1], [0, 0, 1, 1], [], []>} : vector<16x32xbf16>, vector<32x128xbf16>, vector<16x128xf32> -> vector<16x128xf32>
    %6 = vector.broadcast %2 : vector<1x128xf32> to vector<16x128xf32>
    %7 = arith.addf %5, %6 : vector<16x128xf32>
    %cst_9 = arith.constant 0.000000e+00 : f32
    %8 = vector.broadcast %cst_9 : f32 to vector<16x128xf32>
    %9 = arith.maximumf %7, %8 : vector<16x128xf32>
    %10 = arith.truncf %9 : vector<16x128xf32> to vector<16x128xbf16>
    %cst_10 = arith.constant dense<0.000000e+00> : vector<16x128xf32>
    %11 = tpu.matmul %10, %1, %cst_10 {dimension_numbers = #tpu.dot_dimension_numbers<[1], [0], [0], [1], [0, 0, 1, 1], [], []>} : vector<16x128xbf16>, vector<128x128xbf16>, vector<16x128xf32> -> vector<16x128xf32>
    %12 = vector.broadcast %3 : vector<1x128xf32> to vector<16x128xf32>
    %13 = arith.addf %11, %12 : vector<16x128xf32>
    %cst_11 = arith.constant 0.000000e+00 : f32
    %14 = vector.broadcast %cst_11 : f32 to vector<16x128xf32>
    %15 = arith.maximumf %13, %14 : vector<16x128xf32>
    %c0_12 = arith.constant 0 : index
    %c0_13 = arith.constant 0 : index
    %16 = vector.load %arg6[%c0_12, %c0_13] : memref<16x128xf32, #tpu.memory_space<vmem>>, vector<16x128xf32>
    tpu.vector_store %arg6[%c0_12, %c0_13], %15 {strides = array<i32>} : memref<16x128xf32, #tpu.memory_space<vmem>>, vector<16x128xf32>,
    return
  }
  func.func @transform_0(%arg0: i32) -> (i32, i32) {
    %c0_i32 = arith.constant 0 : i32
    %c0_i32_0 = arith.constant 0 : i32
    return %arg0, %c0_i32 : i32, i32
  }
  func.func @transform_1(%arg0: i32) -> (i32, i32) {
    %c0_i32 = arith.constant 0 : i32
    %c0_i32_0 = arith.constant 0 : i32
    %c0_i32_1 = arith.constant 0 : i32
    return %c0_i32, %c0_i32_0 : i32, i32
  }
  func.func @transform_2(%arg0: i32) -> (i32, i32) {
    %c0_i32 = arith.constant 0 : i32
    %c0_i32_0 = arith.constant 0 : i32
    %c0_i32_1 = arith.constant 0 : i32
    return %c0_i32, %c0_i32_0 : i32, i32
  }
  func.func @transform_3(%arg0: i32) -> (i32, i32) {
    %c0_i32 = arith.constant 0 : i32
    %c0_i32_0 = arith.constant 0 : i32
    %c0_i32_1 = arith.constant 0 : i32
    return %c0_i32, %c0_i32_0 : i32, i32
  }
  func.func @transform_4(%arg0: i32) -> (i32, i32) {
    %c0_i32 = arith.constant 0 : i32
    %c0_i32_0 = arith.constant 0 : i32
    %c0_i32_1 = arith.constant 0 : i32
    return %c0_i32, %c0_i32_0 : i32, i32
  }
  func.func @transform_5(%arg0: i32) -> (i32, i32) {
    %c0_i32 = arith.constant 0 : i32
    %c0_i32_0 = arith.constant 0 : i32
    return %arg0, %c0_i32 : i32, i32
  }
}

</mosaic_0001>

<bundles_post_ra>
// kernel: tpu_custom_call.1
= control target key start
LH: loop header
LB: loop body
LE: loop exit
PB: predicated region body
PF: predicated region fallthrough
CT: control target
= control target key end

     0   :  { %10 = vsyncpa [#allocation3], 0  ;;  %s1127_s0 = inlined_call_operand.hbm [shape: bf16[32,32], index: 0, kind: input, shape index: {}]   ;;  %s1128_s1 = inlined_call_operand.hbm [shape: bf16[32,128], index: 1, kind: input, shape index: {}]   ;;  %s1129_s2 = inlined_call_operand.vmem [shape: f32[1,128], index: 2, kind: input, shape index: {}]   ;;  %s1130_s3 = inlined_call_operand.hbm [shape: bf16[128,128], index: 3, kind: input, shape index: {}]   ;;  %s1131_s4 = inlined_call_operand.vmem [shape: f32[1,128], index: 4, kind: input, shape index: {}]   ;;  %s1132_s5 = inlined_call_operand.hbm [shape: f32[32,128], index: 5, kind: output, shape index: {}]  }
   0x1   :  { %12 = vsyncpa [#allocation3 + $0x1], 0 }
   0x2   :  { %13 = vsyncpa [#allocation6], 0 }
   0x3   :  { %14 = vsyncpa [#allocation4], 0 }
   0x4   :  { %16 = vsyncpa [#allocation4 + $0x1], 0  ;;  %s923_s18 = smov 0   ;;  %s925_s19 = smov 0  }
   0x5   :  { %s927_s20 = smov 0   ;;  %s929_s21 = smov 0  }
   0x6 LB: > { %s944_s22 = sadd.s32 4294967295, %s881_s21   ;;  %s575_s23 = sadd.s32 4294967294, %s881_s21   ;;  %s881_s21 = sphi %s929_s21, %s1155_s21   ;;  %s877_s20 = sphi %s927_s20, %s1154_s20   ;;  %s873_s19 = sphi %s925_s19, %s1153_s19   ;;  %s869_s18 = sphi %s923_s18, %s1152_s18  }
   0x7   : > { %p42_p0 = scmp.ne.s32.totalorder %s873_s19, %s869_s18  ;;  %p1133_p1 = scmp.eq.s32.totalorder %s944_s22, 0 }
   0x8   : > { %p150_p2 = scmp.eq.s32.totalorder %s944_s22, 1  ;;  %p156_p3 = scmp.eq.s32.totalorder %s575_s23, 1 }
   0x9   : > { %p953_p4 = por %p1133_p1, %p42_p0  ;;  %p576_p5 = scmp.ge.s32.totalorder %s881_s21, 1 }
   0xa   : > { %p958_p6 = por %p156_p3, %p42_p0  ;;  %p163_p7 = scmp.lt.s32.totalorder %s881_s21, 3 }
   0xb   : > { %s1138_s24 = scalar_select %p953_p4, 1, 0 }
   0xc   : > { %s1139_s25 = scalar_select %p958_p6, 1, 0 }
   0xd   : > { %p963_p8 = pnand %p576_p5, %p163_p7  ;;  %s883_s27 = smov [#allocation5]  }
   0xe   : > { %s175_s28 = sshll.u32 %s883_s27, 4  ;;  %s884_s30 = smov [#allocation7]   ;;  %s176_s28 = int_to_ptr.vmem [resolvable:$true] %s175_s28 }
   0xf   : > { %s1140_s26 = scalar_select %p963_p8, 1, 0 }
  0x10   : > { %p661_p9 = pneg %p963_p8  ;;  %s191_s6 = sshll.u32 %s884_s30, 4  ;;  %s192_s6 = int_to_ptr.vmem [resolvable:$true] %s191_s6 }
  0x11   : > { %s744_s7 = scalar_lea.vmem %s176_s28, 256  ;;  %p752_p5 = scmp.lt.s32.totalorder %s176_s28, %s176_s28 }
  0x12   : > { %p972_p11 = pnand %p661_p9, %p1133_p1  ;;  %p745_p13 = scmp.ne.s32.totalorder %s176_s28, %s744_s7 }
  0x13   : > { %p753_p7 = scmp.lt.s32.totalorder %s744_s7, %s744_s7 }
  0x14   : > { %p735_p12 = pneg %p972_p11 }
  0x15   : > { %p754_p10 = por %p753_p7, %p752_p5 }
  0x16   : > { %p747_p0 = pnand %p745_p13, %p735_p12 }
  0x18   : > { %p748_p3 = pneg %p747_p0 }
  0x1a   : > { %p755_p9 = pnand %p754_p10, %p748_p3 }
  0x1c   : > { %758 = shalt.err (!%p755_p9)
}
  0x1d   : > { %s1134_s8 = smov 64   ;;  %s886_s9 = smov 4  }
  0x1e   : > { %664 = dma.hbm_to_vmem [thread:$0]  (!%p972_p11), %s1128_s1, 256, %s176_s28, [#allocation6], %s1134_s8, %s1134_s8, %s886_s9  }
  0x1f   : > { %s770_s12 = scalar_lea.vmem %s192_s6, 1024  ;;  %p778_p10 = scmp.lt.s32.totalorder %s192_s6, %s192_s6 }
  0x20   : > { %p771_p13 = scmp.ne.s32.totalorder %s192_s6, %s770_s12  ;;  %p779_p3 = scmp.lt.s32.totalorder %s770_s12, %s770_s12 }
  0x22   : > { %p773_p0 = pnand %p771_p13, %p735_p12  ;;  %p780_p7 = por %p779_p3, %p778_p10 }
  0x24   : > { %p774_p5 = pneg %p773_p0 }
  0x26   : > { %p781_p9 = pnand %p780_p7, %p774_p5 }
  0x28   : > { %784 = shalt.err (!%p781_p9)
}
  0x29   : > { %667 = dma.hbm_to_vmem [thread:$0]  (!%p972_p11), %s1130_s3, 1024, %s192_s6, [#allocation6], %s1134_s8, %s1134_s8, %s886_s9  }
  0x2a   : > { %s1001_s15 = sadd.s32 1, %s881_s21   ;;  %s29_s16 = sadd.s32 1, %s877_s20 }
  0x2b   : > { %s26_s17 = ssub.s32 %s881_s21, %s1001_s15  ;;  %p36_p12 = scmp.ne.s32.totalorder %s877_s20, %s873_s19 }
  0x2c   : > { %p27_p13 = scmp.eq.s32.totalorder %s26_s17, 0  ;;  %p37_p0 = scmp.eq.s32.totalorder %s881_s21, 0 }
  0x2d   : > { %p1011_p5 = por %p150_p2, %p36_p12  ;;  %p678_p10 = scmp.lt.s32.totalorder %s881_s21, 2 }
  0x2e   : > { %s1017_s27 = scalar_select %p27_p13, %s877_s20, %s29_s16  }
  0x2f   : > { %s1142_s23 = scalar_select %p1011_p5, 1, 0 }
  0x30   : > { %p38_p3 = por %p37_p0, %p36_p12  ;;  %s208_s28 = sand.u32 1, %s877_s20  }
  0x31   : > { %s580_s29 = sshll.u32 %s208_s28, 3  ;;  %s607_s30 = sshll.u32 %s881_s21, 7 }
  0x32   : > { %s1024_s10 = scalar_lea.hbm %s1127_s0, %s607_s30  ;;  %s212_s11 = scalar_lea.vmem [#allocation2], %s580_s29 }
  0x33   : > { %s219_s12 = sshll.u32 %s212_s11, 4  ;;  %p1028_p2 = pnand %p678_p10, %p38_p3  ;;  %s1026_s12 = int_to_ptr.vmem [resolvable:$true] %s219_s12 }
  0x34   : > { %s1032_s14 = scalar_lea.sflag [#allocation3], %s208_s28  ;;  %s785_s16 = scalar_lea.hbm %s1024_s10, 128 }
  0x35   : > { %p786_p11 = scmp.ne.s32.totalorder %s1024_s10, %s785_s16  ;;  %p787_p7 = pneg %p1028_p2 }
  0x36   : > { %s790_s29 = scalar_lea.hbm %s1127_s0, 256  ;;  %p791_p13 = scmp.lt.s32.totalorder %s1024_s10, %s1127_s0 }
  0x37   : > { %p788_p9 = pnand %p787_p7, %p786_p11  ;;  %p792_p0 = scmp.lt.s32.totalorder %s790_s29, %s785_s16 }
  0x39   : > { %p789_p12 = pneg %p788_p9  ;;  %p793_p10 = por %p792_p0, %p791_p13 }
  0x3b   : > { %p794_p3 = pnand %p793_p10, %p789_p12 }
  0x3d   : > { %797 = shalt.err (!%p794_p3)
}
  0x3e   : > { %s798_s28 = scalar_lea.vmem %s1026_s12, 128  ;;  %s887_s11 = smov [#allocation2]  }
  0x3f   : > { %p799_p1 = scmp.ne.s32.totalorder %s1026_s12, %s798_s28  ;;  %s803_s8 = sshll.u32 %s887_s11, 4  ;;  %s804_s8 = int_to_ptr.vmem [resolvable:$false] %s803_s8 }
  0x40   : > { %s805_s17 = scalar_lea.vmem %s804_s8, 256  ;;  %p806_p9 = scmp.lt.s32.totalorder %s1026_s12, %s804_s8 }
  0x41   : > { %p801_p6 = pnand %p799_p1, %p787_p7  ;;  %p807_p5 = scmp.lt.s32.totalorder %s805_s17, %s798_s28 }
  0x43   : > { %p802_p11 = pneg %p801_p6  ;;  %p808_p4 = por %p807_p5, %p806_p9 }
  0x45   : > { %p809_p8 = pnand %p808_p4, %p802_p11 }
  0x47   : > { %812 = shalt.err (!%p809_p8)
}
  0x48   : > { %s1144_s16 = smov 64   ;;  %p1145_p1 = scmp.ne.s32.totalorder %s1140_s26, 0 }
  0x49   : > { %671 = dma.hbm_to_vmem [thread:$0]  (!%p1028_p2), %s1024_s10, 128, %s1026_s12, %s1032_s14, %s1144_s16, %s1144_s16, %s886_s9  }
  0x4a   : > { %231 = sbr.rel (%p1145_p1) target bundleno = 511 (0x1ff), region = 40  ;;  %s1059_s30 = sand.u32 (!%p1145_p1), 1, %s873_s19  }
  0x4b   : > { %s584_s8 = sshll.u32 (!%p1145_p1), %s1059_s30, 3  ;;  %s234_s29 = scalar_lea.sflag (!%p1145_p1), [#allocation3], %s1059_s30 }
  0x4c   : > { %s237_s6 = scalar_lea.vmem (!%p1145_p1), [#allocation2], %s584_s8  ;;  %p1146_p4 = scmp.ne.s32.totalorder (!%p1145_p1), %s1138_s24, 0 }
  0x4f   : > { %856 = dma.done.wait (%p1146_p4), %s234_s29, 128  }
  0x50   : > { %858 = vsyncadd (%p1146_p4), %s234_s29, 4294967168  ;;  %p1147_p6 = scmp.eq.s32.totalorder %s944_s22, 0 }
  0x52   : > { %860 = dma.done.wait (%p1147_p6), [#allocation6], 1280   ;;  %p1148_p8 = pmov %p1147_p6 }
  0x53   : > { %v888_v0 = vmov 0.0   ;;  %vm889_vm0 = vmmov 0   ;;  %v722_v1 = vld [vmem:[#allocation5 + $0x8] sm:$0xff]   ;;  %v723_v2 = vld [vmem:[#allocation5] sm:$0xff]   ;;  %v724_v4 = vld [vmem:[%s237_s6] sm:$0xff]   ;;  %vm322_vm1 = vcmask 261120  }
  0x54   : > { %862 = vsyncadd (%p1148_p8), [#allocation6], 4294966016  ;;  %621 = vmatprep.subr.bf16.mxu0 %v888_v0  ;;  %625 = vmatprep.mubr.msk.bf16.mxu0 %vm889_vm0, %v888_v0  ;;  %v725_v3 = vld [vmem:[#allocation7 + $0x38] sm:$0xff]   ;;  %v726_v5 = vld [vmem:[#allocation7 + $0x30] sm:$0xff]   ;;  %s587_s9 = sshll.u32 %s1059_s30, 4  ;;  %s608_s7 = sshll.u32 %s944_s22, 8 }
  0x55   : > { %629 = vmatprep.subr.bf16.mxu1 %v888_v0  ;;  %645 = vmatprep.mubr.msk.bf16.mxu1 %vm889_vm0, %v888_v0  ;;  %v727_v6 = vld [vmem:[#allocation7 + $0x28] sm:$0xff]   ;;  %v728_v7 = vld [vmem:[#allocation7 + $0x20] sm:$0xff]   ;;  %v729_v8 = vld [vmem:[#allocation7 + $0x18] sm:$0xff]   ;;  %s271_s13 = scalar_lea.vmem [#allocation8], %s587_s9  ;;  %s1084_s17 = scalar_lea.hbm %s1132_s5, %s608_s7 }
  0x56   : > { %622 = vmatpush3.bf16.msra.mxu0 %v722_v1  ;;  %630 = vmatpush3.bf16.msra.mxu1 %v725_v3  ;;  %v730_v9 = vld [vmem:[#allocation7 + $0x10] sm:$0xff]   ;;  %v731_v10 = vld [vmem:[#allocation7 + $0x8] sm:$0xff]   ;;  %v732_v11 = vld [vmem:[#allocation7] sm:$0xff]   ;;  %s483_s14 = sshll.u32 %s271_s13, 4  ;;  %s470_s16 = scalar_lea.sflag [#allocation4], %s1059_s30  ;;  %s1079_s14 = int_to_ptr.vmem [resolvable:$true] %s483_s14 }
  0x57   : > { %623 = vmatprep.subr.bf16.mxu0 %v888_v0  ;;  %631 = vmatprep.subr.bf16.mxu1 %v888_v0  ;;  %v588_v12 = vld [vmem:[%s1129_s2] ss:$0 sm:$0xff]  ;;  %s813_s8 = scalar_lea.vmem %s1079_s14, 256  ;;  %p1149_p2 = scmp.ne.s32.totalorder %s1142_s23, 0 }
  0x58   : > { %v593_v22 = vld [vmem:[%s1131_s4] ss:$0 sm:$0xff]  ;;  %p814_p5 = scmp.ne.s32.totalorder %s1079_s14, %s813_s8  ;;  %s890_s22 = smov [#allocation8]  }
  0x59   : > { %s817_s29 = sshll.u32 %s890_s22, 4  ;;  %s818_s29 = int_to_ptr.vmem [resolvable:$false] %s817_s29 }
  0x5a   : > { %624 = vmatpush3.bf16.msra.mxu0 %v723_v2  ;;  %632 = vmatpush3.bf16.msra.mxu1 %v726_v5  ;;  %p815_p7 = pnand %p814_p5, %p1149_p2  ;;  %s819_s6 = scalar_lea.vmem %s818_s29, 512 }
  0x5b   : > { %633 = vmatprep.subr.bf16.mxu1 %v888_v0  ;;  %p820_p13 = scmp.lt.s32.totalorder %s1079_s14, %s818_s29  ;;  %p821_p0 = scmp.lt.s32.totalorder %s819_s6, %s813_s8 }
  0x5c   : > { %p816_p12 = pneg %p815_p7 }
  0x5d   : > { %626 = vmatmul.mubr.msk.bf16.vlgmr.msra.gmra.mxu0 %vm322_vm1, %v724_v4  ;;  %p822_p10 = por %p821_p0, %p820_p13 }
  0x5e   : > { %634 = vmatpush3.bf16.msra.mxu1 %v727_v6 }
  0x5f   : > { %635 = vmatprep.subr.bf16.mxu1 %v888_v0  ;;  %p823_p3 = pnand %p822_p10, %p816_p12 }
  0x62   : > { %636 = vmatpush3.bf16.msra.mxu1 %v728_v7 }
  0x63   : > { %637 = vmatprep.subr.bf16.mxu1 %v888_v0 }
  0x66   : > { %638 = vmatpush3.bf16.msra.mxu1 %v729_v8 }
  0x67   : > { %639 = vmatprep.subr.bf16.mxu1 %v888_v0 }
  0x6a   : > { %640 = vmatpush3.bf16.msra.mxu1 %v730_v9 }
  0x6b   : > { %641 = vmatprep.subr.bf16.mxu1 %v888_v0 }
  0x6e   : > { %642 = vmatpush3.bf16.msra.mxu1 %v731_v10 }
  0x6f   : > { %643 = vmatprep.subr.bf16.mxu1 %v888_v0 }
  0x72   : > { %644 = vmatpush3.bf16.msra.mxu1 %v732_v11 }
 0x11d   : > { %v360_v13 = vpop.f32.mrf.mxu0 }
 0x11e   : > { %v361_v15 = vadd.f32 %v588_v12, %v360_v13 }
 0x11f   : > { %v627_v14 = vpop.f32.mrf.mxu0 }
 0x120   : > { %v367_v19 = vmax.f32 %v361_v15, 0.0 }
 0x121   : > { %v363_v16 = vpop.f32.mrf.mxu0 }
 0x122   : > { %v364_v17 = vadd.f32 %v588_v12, %v363_v16 }
 0x123   : > { %v628_v18 = vpop.f32.mrf.mxu0 }
 0x124   : > { %v368_v20 = vmax.f32 %v364_v17, 0.0 }
 0x126   : > { %v369_v21 = vpack.c.bf16 %v368_v20, %v367_v19 }
 0x128   : > { %646 = vmatmul.mubr.bf16.vlgmr.msra.gmra.mxu1 %v369_v21 }
 0x1e8   : > { %v458_v23 = vpop.f32.mrf.mxu1 }
 0x1e9   : > { %v459_v24 = vadd.f32 %v593_v22, %v458_v23 }
 0x1ea   : > { %v647_v25 = vpop.f32.mrf.mxu1 }
 0x1eb   : > { %v465_v26 = vmax.f32 %v459_v24, 0.0 }
 0x1ec   : > { %v461_v27 = vpop.f32.mrf.mxu1 }
 0x1ed   : > { %467 = vst [vmem:[%s271_s13] sm:$0xff] %v465_v26  ;;  %v462_v28 = vadd.f32 %v593_v22, %v461_v27 }
 0x1ee   : > { %v648_v29 = vpop.f32.mrf.mxu1 }
 0x1ef   : > { %v466_v30 = vmax.f32 %v462_v28, 0.0 }
 0x1f1   : > { %468 = vst [vmem:[%s271_s13 + $0x8] sm:$0xff] %v466_v30 }
 0x1f2   : > { %826 = shalt.err (!%p823_p3)
}
 0x1f3   : > { %s827_s24 = scalar_lea.hbm %s1084_s17, 256  ;;  %s831_s10 = scalar_lea.hbm %s1132_s5, 512 }
 0x1f4   : > { %p828_p11 = scmp.ne.s32.totalorder %s1084_s17, %s827_s24  ;;  %p832_p4 = scmp.lt.s32.totalorder %s1084_s17, %s1132_s5 }
 0x1f5   : > { %p833_p6 = scmp.lt.s32.totalorder %s831_s10, %s827_s24 }
 0x1f6   : > { %p829_p9 = pnand %p828_p11, %p1149_p2 }
 0x1f7   : > { %p834_p8 = por %p833_p6, %p832_p4 }
 0x1f8   : > { %p830_p1 = pneg %p829_p9 }
 0x1fa   : > { %p835_p5 = pnand %p834_p8, %p830_p1 }
 0x1fc   : > { %838 = shalt.err (!%p835_p5)
}
 0x1fd   : > { %s891_s7 = smov 128   ;;  %s892_s28 = smov 8  }
 0x1fe   : > { %659 = dma.vmem_to_hbm [thread:$0]  (%p1149_p2), %s1079_s14, 256, %s1084_s17, %s470_s16, %s891_s7, %s891_s7, %s892_s28  }
 0x1ff PF: > { %s498_s11 = sand.u32 1, %s869_s18   ;;  %p1150_p7 = scmp.ne.s32.totalorder %s1139_s25, 0 }
 0x200   : > { %p1151_p12 = scmp.ge.s32.totalorder %s881_s21, 2  ;;  %s499_s8 = scalar_lea.sflag [#allocation4], %s498_s11 }
 0x202   : > { %p673_p13 = pnand %p1151_p12, %p1150_p7 }
 0x204   : > { %p674_p0 = pneg %p673_p13 }
 0x206   : > { %864 = dma.done.wait (%p674_p0), %s499_s8, 256  }
 0x207   : > { %866 = vsyncadd (%p674_p0), %s499_s8, 4294967040  ;;  %p19_p10 = scmp.ge.s32.totalorder %s1001_s15, 4   ;;  %s1152_s18 = smov %s873_s19 }
 0x208   : > { %s1153_s19 = smov %s877_s20  ;;  %s1154_s20 = smov %s1017_s27 }
 0x209   : > { %s1155_s21 = smov %s1001_s15  ;;  %21 = sbr.rel (!%p19_p10) target bundleno = 6 (0x6), region = 93 }
 0x20e   :  { %504 = vsyncpa [#allocation3], 1 }
 0x20f   :  { %506 = vsyncpa [#allocation3 + $0x1], 1 }
 0x210   :  { %507 = vsyncpa [#allocation6], 1 }
 0x211   :  { %508 = vsyncpa [#allocation4], 1 }
 0x212   :  { %510 = vsyncpa [#allocation4 + $0x1], 1 }

</bundles_post_ra>
